<compile_context>
chip_gen: v6e
topology: v6e:2x2x1
jax: 0.10.0
libtpu: 0.0.40
codegen_flags: <defaults>
</compile_context>

<pallas_src>
import functools

import jax
import jax.numpy as jnp
from jax.experimental import pallas as pl
from jax.experimental.pallas import tpu as pltpu


def _round_up(x, m):
    return ((x + m - 1) // m) * m


def _vmem_capacity_bytes():
    try:
        return int(pltpu.get_tpu_info().vmem_capacity_bytes)
    except Exception:
        return 64 * 1024 * 1024  # conservative fallback (v7x-sized)


def _activation(h, leakyrelu):
    if leakyrelu:
        return jnp.where(h >= 0.0, h, 0.01 * h)  # PyTorch LeakyReLU default slope 0.01
    return jnp.maximum(h, 0.0)


def _mlp_kernel_fused(x_ref, w1_ref, b1_ref, w2_ref, b2_ref, o_ref, *, leakyrelu):
    # [TB, in_p] @ [in_p, hid_p] on the MXU, f32 accumulation, + bias in f32.
    h = jnp.dot(x_ref[...], w1_ref[...], preferred_element_type=jnp.float32) + b1_ref[...]
    h = _activation(h, leakyrelu)
    # Dropout is Identity (dropout_rate=None / eval semantics).
    h = h.astype(w2_ref.dtype)
    y = jnp.dot(h, w2_ref[...], preferred_element_type=jnp.float32) + b2_ref[...]
    o_ref[...] = y.astype(o_ref.dtype)


def _mlp_kernel_hidden_chunked(x_ref, w1_ref, b1_ref, w2_ref, b2_ref, o_ref, acc_ref, *,
                               leakyrelu):
    # Hidden dim is tiled on grid axis 1 ("arbitrary"); accumulate partial products of the
    # second matmul into a resident f32 VMEM scratch, finalize on the last chunk.
    h_idx = pl.program_id(1)
    h = jnp.dot(x_ref[...], w1_ref[...], preferred_element_type=jnp.float32) + b1_ref[...]
    h = _activation(h, leakyrelu)
    part = jnp.dot(h.astype(w2_ref.dtype), w2_ref[...], preferred_element_type=jnp.float32)

    @pl.when(h_idx == 0)
    def _():
        acc_ref[...] = part + b2_ref[...]

    @pl.when(h_idx > 0)
    def _():
        acc_ref[...] += part

    @pl.when(h_idx == pl.num_programs(1) - 1)
    def _():
        o_ref[...] = acc_ref[...].astype(o_ref.dtype)


def make_mlp(w1, b1, w2, b2, *, leakyrelu=False, compute_dtype=jnp.bfloat16,
             out_dtype=None, hidden_chunk=None):
    """Build apply(x) computing (x @ w1 + b1) -> ReLU/LeakyReLU -> Identity -> (@ w2 + b2).

    Weights are stored [in, out] (transposed relative to PyTorch's [out, in]).
    compute_dtype is the MXU operand dtype (bf16 recommended; on v5e the f32 path is
    validation-only). Accumulation is always f32. Padding/casting of the weights is done
    once here, not per call.
    """
    in_f, hidden = w1.shape
    hid2, out_f = w2.shape
    assert hid2 == hidden and b1.shape == (hidden,) and b2.shape == (out_f,)

    cdt = jnp.dtype(compute_dtype)
    cdt_b = cdt.itemsize

    # Lane-dense padding: feature dims up to multiples of 128.
    in_p = _round_up(in_f, 128)
    hid_p = _round_up(hidden, 128)
    out_p = _round_up(out_f, 128)

    # Hoisted out of the per-call path: pad + cast weights/biases once.
    w1_p = jnp.pad(w1, ((0, in_p - in_f), (0, hid_p - hidden))).astype(cdt)
    w2_p = jnp.pad(w2, ((0, hid_p - hidden), (0, out_p - out_f))).astype(cdt)
    b1_p = jnp.pad(b1, (0, hid_p - hidden)).reshape(1, hid_p).astype(jnp.float32)
    b2_p = jnp.pad(b2, (0, out_p - out_f)).reshape(1, out_p).astype(jnp.float32)

    vmem_cap = _vmem_capacity_bytes()
    vmem_budget = min(int(vmem_cap * 0.85), 112 * 1024 * 1024)

    row_mult = 16 if cdt_b <= 2 else 8  # bf16 packs 16 rows per vreg, f32 packs 8

    def _vmem_fused(tb):
        w = (in_p * hid_p + hid_p * out_p) * cdt_b + (hid_p + out_p) * 4  # single-buffered
        xb = 2 * tb * in_p * cdt_b                                        # double-buffered
        ob = 2 * tb * out_p * 4                                           # double-buffered
        hb = tb * hid_p * (4 + cdt_b)                                     # f32 h + cast copy
        return w + xb + ob + hb

    def _vmem_chunked(tb, th):
        w = 2 * ((in_p * th + th * out_p) * cdt_b + th * 4) + out_p * 4   # chunk weights 2x-buf
        xb = 2 * tb * in_p * cdt_b
        ob = 2 * tb * out_p * 4
        hb = tb * th * (4 + cdt_b)
        acc = tb * out_p * 4
        return w + xb + ob + hb + acc

    def apply(x):
        B = x.shape[0]
        odt = jnp.dtype(out_dtype) if out_dtype is not None else x.dtype
        B_al = _round_up(B, row_mult)

        # Candidate batch tiles: standard sizes plus the exact padded batch (zero waste).
        cands = [c for c in (1024, 768, 512, 384, 256, 128)
                 if c % row_mult == 0 and c <= B_al]
        if B_al <= 1024:
            cands.append(B_al)
        if not cands:
            cands = [B_al]
        cands = sorted(set(cands))

        def _choose(cs):
            def key(tb):
                bp = _round_up(B_al, tb)
                return (bp - B_al, 0 if bp // tb >= 2 else 1, -tb)
            return min(cs, key=key)

        use_chunk = hidden_chunk is not None and _round_up(hidden_chunk, 128) < hid_p
        tb = None
        th = hid_p
        if not use_chunk:
            fit = [c for c in cands if _vmem_fused(c) <= vmem_budget]
            if fit:
                tb = _choose(fit)
            else:
                use_chunk = True  # fused weights + full-width h would not fit -> chunk hidden
        if use_chunk:
            if hidden_chunk is not None:
                th = min(_round_up(hidden_chunk, 128), hid_p)
            else:
                th = 512 if (hid_p % 512 == 0 and hid_p >= 512) else (
                    256 if (hid_p % 256 == 0 and hid_p >= 256) else 128)
            while hid_p % th:
                th -= 128
            fit = [c for c in cands if _vmem_chunked(c, th) <= vmem_budget] or [min(cands)]
            tb = _choose(fit)

        # Guarantee >=2 grid steps on the "parallel" batch axis when possible so v7x's
        # second TensorCore gets work; splitting one full tile costs <= row_mult extra rows.
        if _round_up(B_al, tb) // tb < 2 and B_al >= 2 * row_mult:
            half = _round_up((B_al + 1) // 2, row_mult)
            if half < tb:
                tb = half

        Bp = _round_up(B_al, tb)

        pad_b, pad_f = Bp - B, in_p - in_f
        x_p = jnp.pad(x, ((0, pad_b), (0, pad_f))) if (pad_b or pad_f) else x
        if x_p.dtype != cdt:
            x_p = x_p.astype(cdt)

        flops = int(2 * Bp * (in_p * hid_p + hid_p * out_p))
        bytes_accessed = int(
            Bp * in_p * cdt_b
            + (in_p * hid_p + hid_p * out_p) * cdt_b
            + (hid_p + out_p) * 4
            + Bp * out_p * odt.itemsize)
        cost = pl.CostEstimate(flops=flops, transcendentals=0, bytes_accessed=bytes_accessed)

        if not use_chunk:
            kernel = functools.partial(_mlp_kernel_fused, leakyrelu=leakyrelu)
            out_padded = pl.pallas_call(
                kernel,
                out_shape=jax.ShapeDtypeStruct((Bp, out_p), odt),
                grid=(Bp // tb,),
                in_specs=[
                    # Activations stream over the batch grid axis.
                    pl.BlockSpec((tb, in_p), lambda i: (i, 0)),
                    # Constant-index (VMEM-resident) weights/biases: single-buffer them.
                    pl.BlockSpec((in_p, hid_p), lambda i: (0, 0),
                                 pipeline_mode=pl.Buffered(1)),
                    pl.BlockSpec((1, hid_p), lambda i: (0, 0),
                                 pipeline_mode=pl.Buffered(1)),
                    pl.BlockSpec((hid_p, out_p), lambda i: (0, 0),
                                 pipeline_mode=pl.Buffered(1)),
                    pl.BlockSpec((1, out_p), lambda i: (0, 0),
                                 pipeline_mode=pl.Buffered(1)),
                ],
                out_specs=pl.BlockSpec((tb, out_p), lambda i: (i, 0)),
                compiler_params=pltpu.CompilerParams(
                    dimension_semantics=("parallel",),
                    vmem_limit_bytes=int(vmem_budget)),
                cost_estimate=cost,
            )(x_p, w1_p, b1_p, w2_p, b2_p)
        else:
            kernel = functools.partial(_mlp_kernel_hidden_chunked, leakyrelu=leakyrelu)
            out_padded = pl.pallas_call(
                kernel,
                out_shape=jax.ShapeDtypeStruct((Bp, out_p), odt),
                grid=(Bp // tb, hid_p // th),
                in_specs=[
                    pl.BlockSpec((tb, in_p), lambda i, h: (i, 0)),
                    pl.BlockSpec((in_p, th), lambda i, h: (0, h)),
                    pl.BlockSpec((1, th), lambda i, h: (0, h)),
                    pl.BlockSpec((th, out_p), lambda i, h: (h, 0)),
                    pl.BlockSpec((1, out_p), lambda i, h: (0, 0),
                                 pipeline_mode=pl.Buffered(1)),
                ],
                out_specs=pl.BlockSpec((tb, out_p), lambda i, h: (i, 0)),
                scratch_shapes=[pltpu.VMEM((tb, out_p), jnp.float32)],
                compiler_params=pltpu.CompilerParams(
                    dimension_semantics=("parallel", "arbitrary"),
                    vmem_limit_bytes=int(vmem_budget)),
                cost_estimate=cost,
            )(x_p, w1_p, b1_p, w2_p, b2_p)

        return out_padded[:B, :out_f]

    return apply


def mlp_pallas(x, w1, b1, w2, b2, **kwargs):
    """One-off convenience wrapper (pays the weight pad/cast per call; prefer make_mlp)."""
    return make_mlp(w1, b1, w2, b2, **kwargs)(x)


def mlp_reference(x, w1, b1, w2, b2, *, leakyrelu=False):
    h = x @ w1 + b1
    h = jnp.where(h >= 0.0, h, 0.01 * h) if leakyrelu else jnp.maximum(h, 0.0)
    return h @ w2 + b2


if __name__ == "__main__":
    # Small shapes consistent with MLP(in_features=32, hidden_size=64, out_features=16).
    B, in_features, hidden_size, out_features = 8, 32, 64, 16

    key = jax.random.PRNGKey(0)
    kx, kw1, kb1, kw2, kb2, kw3, kb3 = jax.random.split(key, 7)

    x = jax.random.normal(kx, (B, in_features), dtype=jnp.float32)
    # Deterministic init mimicking nn.Linear's uniform(-1/sqrt(fan_in), 1/sqrt(fan_in)).
    lim1 = 1.0 / jnp.sqrt(jnp.float32(in_features))
    lim2 = 1.0 / jnp.sqrt(jnp.float32(hidden_size))
    # Stored as [in, out] (transposed relative to PyTorch's [out, in] layout).
    w1 = jax.random.uniform(kw1, (in_features, hidden_size), jnp.float32, -lim1, lim1)
    b1 = jax.random.uniform(kb1, (hidden_size,), jnp.float32, -lim1, lim1)
    w2 = jax.random.uniform(kw2, (hidden_size, out_features), jnp.float32, -lim2, lim2)
    b2 = jax.random.uniform(kb2, (out_features,), jnp.float32, -lim2, lim2)

    # 1) bf16-operand fused path (MXU-native) — ReLU variant.
    mlp_relu = jax.jit(make_mlp(w1, b1, w2, b2, leakyrelu=False))
    out_bf16 = jax.block_until_ready(mlp_relu(x))
    ref_relu = mlp_reference(x, w1, b1, w2, b2, leakyrelu=False)
    assert out_bf16.shape == (B, out_features)
    assert jnp.allclose(out_bf16, ref_relu, atol=2e-2, rtol=2e-2)

    # 2) f32-operand fused path — LeakyReLU variant, tight tolerance (validation-only on v5e).
    mlp_leaky = jax.jit(make_mlp(w1, b1, w2, b2, leakyrelu=True,
                                 compute_dtype=jnp.float32))
    out_f32 = jax.block_until_ready(mlp_leaky(x))
    ref_leaky = mlp_reference(x, w1, b1, w2, b2, leakyrelu=True)
    assert out_f32.shape == (B, out_features)
    assert jnp.allclose(out_f32, ref_leaky, atol=1e-5, rtol=1e-5)

    # 3) Hidden-dimension chunked path (forced) — validates the accumulate/finalize logic
    #    that keeps VMEM flat in hidden_size on v7x. hidden=256 chunked into 2x128.
    hidden_big = 256
    lim3 = 1.0 / jnp.sqrt(jnp.float32(hidden_big))
    w1b = jax.random.uniform(kw3, (in_features, hidden_big), jnp.float32, -lim1, lim1)
    b1b = jax.random.uniform(kb3, (hidden_big,), jnp.float32, -lim1, lim1)
    w2b = jax.random.uniform(kw2, (hidden_big, out_features), jnp.float32, -lim3, lim3)
    b2b = jax.random.uniform(kb2, (out_features,), jnp.float32, -lim3, lim3)
    mlp_chunked = jax.jit(make_mlp(w1b, b1b, w2b, b2b, leakyrelu=False,
                                   hidden_chunk=128))
    out_chunked = jax.block_until_ready(mlp_chunked(x))
    ref_chunked = mlp_reference(x, w1b, b1b, w2b, b2b, leakyrelu=False)
    assert out_chunked.shape == (B, out_features)
    assert jnp.allclose(out_chunked, ref_chunked, atol=2e-2, rtol=2e-2)

    # TODO(synk): nn.Dropout train-mode masking not implemented; dropout_rate=None => Identity
    # (eval semantics), which matches the spec's default construction.
    print("KERNEL_OK")
</pallas_src>

<mosaic_0001>
module attributes {stable_mosaic.version = 11 : i64} {
  func.func @_mlp_kernel_fused(%arg0: i32, %arg1: memref<16x128xbf16, #tpu.memory_space<vmem>>, %arg2: memref<128x128xbf16, #tpu.memory_space<vmem>>, %arg3: memref<1x128xf32, #tpu.memory_space<vmem>>, %arg4: memref<128x128xbf16, #tpu.memory_space<vmem>>, %arg5: memref<1x128xf32, #tpu.memory_space<vmem>>, %arg6: memref<16x128xf32, #tpu.memory_space<vmem>>) attributes {dimension_semantics = [#tpu.dimension_semantics<parallel>], iteration_bounds = array<i64: 1>, scalar_prefetch = 0 : i64, scratch_operands = 0 : i64, tpu.core_type = #tpu.core_type<tc>, window_params = [{transform_indices = @transform_0, window_bounds = array<i64: 16, 128>}, {pipeline_mode = #tpu.pipeline_mode<synchronous>, transform_indices = @transform_1, window_bounds = array<i64: 128, 128>}, {pipeline_mode = #tpu.pipeline_mode<synchronous>, transform_indices = @transform_2, window_bounds = array<i64: 1, 128>}, {pipeline_mode = #tpu.pipeline_mode<synchronous>, transform_indices = @transform_3, window_bounds = array<i64: 128, 128>}, {pipeline_mode = #tpu.pipeline_mode<synchronous>, transform_indices = @transform_4, window_bounds = array<i64: 1, 128>}, {transform_indices = @transform_5, window_bounds = array<i64: 16, 128>}]} {
    %c0 = arith.constant 0 : index
    %c0_0 = arith.constant 0 : index
    %0 = vector.load %arg1[%c0, %c0_0] : memref<16x128xbf16, #tpu.memory_space<vmem>>, vector<16x128xbf16>
    %c0_1 = arith.constant 0 : index
    %c0_2 = arith.constant 0 : index
    %1 = vector.load %arg2[%c0_1, %c0_2] : memref<128x128xbf16, #tpu.memory_space<vmem>>, vector<128x128xbf16>
    %cst = arith.constant dense<0.000000e+00> : vector<16x128xf32>
    %2 = tpu.matmul %0, %1, %cst {dimension_numbers = #tpu.dot_dimension_numbers<[1], [0], [0], [1], [0, 0, 1, 1], [], []>} : vector<16x128xbf16>, vector<128x128xbf16>, vector<16x128xf32> -> vector<16x128xf32>
    %c0_3 = arith.constant 0 : index
    %c0_4 = arith.constant 0 : index
    %3 = vector.load %arg3[%c0_3, %c0_4] : memref<1x128xf32, #tpu.memory_space<vmem>>, vector<1x128xf32>
    %4 = vector.broadcast %3 : vector<1x128xf32> to vector<16x128xf32>
    %5 = arith.addf %2, %4 : vector<16x128xf32>
    %cst_5 = arith.constant 0.000000e+00 : f32
    %6 = vector.broadcast %cst_5 : f32 to vector<16x128xf32>
    %7 = arith.maximumf %5, %6 : vector<16x128xf32>
    %8 = arith.truncf %7 : vector<16x128xf32> to vector<16x128xbf16>
    %c0_6 = arith.constant 0 : index
    %c0_7 = arith.constant 0 : index
    %9 = vector.load %arg4[%c0_6, %c0_7] : memref<128x128xbf16, #tpu.memory_space<vmem>>, vector<128x128xbf16>
    %cst_8 = arith.constant dense<0.000000e+00> : vector<16x128xf32>
    %10 = tpu.matmul %8, %9, %cst_8 {dimension_numbers = #tpu.dot_dimension_numbers<[1], [0], [0], [1], [0, 0, 1, 1], [], []>} : vector<16x128xbf16>, vector<128x128xbf16>, vector<16x128xf32> -> vector<16x128xf32>
    %c0_9 = arith.constant 0 : index
    %c0_10 = arith.constant 0 : index
    %11 = vector.load %arg5[%c0_9, %c0_10] : memref<1x128xf32, #tpu.memory_space<vmem>>, vector<1x128xf32>
    %12 = vector.broadcast %11 : vector<1x128xf32> to vector<16x128xf32>
    %13 = arith.addf %10, %12 : vector<16x128xf32>
    %c0_11 = arith.constant 0 : index
    %c0_12 = arith.constant 0 : index
    %14 = vector.load %arg6[%c0_11, %c0_12] : memref<16x128xf32, #tpu.memory_space<vmem>>, vector<16x128xf32>
    tpu.vector_store %arg6[%c0_11, %c0_12], %13 {strides = array<i32>} : memref<16x128xf32, #tpu.memory_space<vmem>>, vector<16x128xf32>,
    return
  }
  func.func @transform_0(%arg0: i32) -> (i32, i32) {
    %c0_i32 = arith.constant 0 : i32
    %c0_i32_0 = arith.constant 0 : i32
    return %arg0, %c0_i32 : i32, i32
  }
  func.func @transform_1(%arg0: i32) -> (i32, i32) {
    %c0_i32 = arith.constant 0 : i32
    %c0_i32_0 = arith.constant 0 : i32
    %c0_i32_1 = arith.constant 0 : i32
    return %c0_i32, %c0_i32_0 : i32, i32
  }
  func.func @transform_2(%arg0: i32) -> (i32, i32) {
    %c0_i32 = arith.constant 0 : i32
    %c0_i32_0 = arith.constant 0 : i32
    %c0_i32_1 = arith.constant 0 : i32
    return %c0_i32, %c0_i32_0 : i32, i32
  }
  func.func @transform_3(%arg0: i32) -> (i32, i32) {
    %c0_i32 = arith.constant 0 : i32
    %c0_i32_0 = arith.constant 0 : i32
    %c0_i32_1 = arith.constant 0 : i32
    return %c0_i32, %c0_i32_0 : i32, i32
  }
  func.func @transform_4(%arg0: i32) -> (i32, i32) {
    %c0_i32 = arith.constant 0 : i32
    %c0_i32_0 = arith.constant 0 : i32
    %c0_i32_1 = arith.constant 0 : i32
    return %c0_i32, %c0_i32_0 : i32, i32
  }
  func.func @transform_5(%arg0: i32) -> (i32, i32) {
    %c0_i32 = arith.constant 0 : i32
    %c0_i32_0 = arith.constant 0 : i32
    return %arg0, %c0_i32 : i32, i32
  }
}

</mosaic_0001>

<bundles_post_ra>
// kernel: apply.1
= control target key start
LH: loop header
LB: loop body
LE: loop exit
PB: predicated region body
PF: predicated region fallthrough
CT: control target
= control target key end

     0   :  { %10 = vsyncpa [#allocation3], 0  ;;  %s493_s0 = inlined_call_operand.vmem [shape: bf16[16,128], index: 0, kind: input, shape index: {}]   ;;  %s494_s1 = inlined_call_operand.hbm [shape: bf16[128,128], index: 1, kind: input, shape index: {}]   ;;  %s495_s2 = inlined_call_operand.vmem [shape: f32[1,128], index: 2, kind: input, shape index: {}]   ;;  %s496_s3 = inlined_call_operand.hbm [shape: bf16[128,128], index: 3, kind: input, shape index: {}]   ;;  %s497_s4 = inlined_call_operand.vmem [shape: f32[1,128], index: 4, kind: input, shape index: {}]   ;;  %s498_s5 = inlined_call_operand.vmem [shape: f32[16,128], index: 5, kind: output, shape index: {}]  }
   0x1   :  { %11 = vsyncpa [#allocation5], 0  ;;  %s436_s18 = smov [#allocation2]  }
   0x2   :  { %s19_s19 = sshll.u32 %s436_s18, 4  ;;  %s20_s19 = int_to_ptr.vmem [resolvable:$true] %s19_s19 }
   0x3   :  { %s400_s20 = scalar_lea.vmem %s20_s19, 1024  ;;  %p405_p1 = scmp.lt.s32.totalorder %s20_s19, %s20_s19 }
   0x4   :  { %p401_p0 = scmp.ne.s32.totalorder %s20_s19, %s400_s20  ;;  %p406_p2 = scmp.lt.s32.totalorder %s400_s20, %s400_s20 }
   0x6   :  { %p407_p3 = por %p406_p2, %p405_p1 }
   0x8   :  { %p408_p4 = pnand %p407_p3, %p401_p0 }
   0xa   :  { %411 = shalt.err (!%p408_p4)
}
   0xb   :  { %s437_s21 = smov 64   ;;  %s438_s22 = smov 4  }
   0xc   :  { %25 = dma.hbm_to_vmem [thread:$0]  %s494_s1, 1024, %s20_s19, [#allocation3], %s437_s21, %s437_s21, %s438_s22  }
   0xd   :  { %s439_s25 = smov [#allocation4]  }
   0xe   :  { %s33_s26 = sshll.u32 %s439_s25, 4  ;;  %s34_s26 = int_to_ptr.vmem [resolvable:$true] %s33_s26 }
   0xf   :  { %s420_s27 = scalar_lea.vmem %s34_s26, 1024  ;;  %p425_p6 = scmp.lt.s32.totalorder %s34_s26, %s34_s26 }
  0x10   :  { %p421_p5 = scmp.ne.s32.totalorder %s34_s26, %s420_s27  ;;  %p426_p7 = scmp.lt.s32.totalorder %s420_s27, %s420_s27 }
  0x12   :  { %p427_p8 = por %p426_p7, %p425_p6 }
  0x14   :  { %p428_p9 = pnand %p427_p8, %p421_p5 }
  0x16   :  { %431 = shalt.err (!%p428_p9)
}
  0x17   :  { %39 = dma.hbm_to_vmem [thread:$0]  %s496_s3, 1024, %s34_s26, [#allocation5], %s437_s21, %s437_s21, %s438_s22  }
  0x18   :  { %432 = dma.done.wait [#allocation3], 1024  }
  0x19   :  { %433 = vsyncadd [#allocation3], 4294966272 }
  0x1a   :  { %434 = dma.done.wait [#allocation5], 1024  }
  0x1b   :  { %435 = vsyncadd [#allocation5], 4294966272  ;;  %v440_v0 = vmov 0.0   ;;  %vm441_vm0 = vmmov 0   ;;  %v375_v1 = vld [vmem:[#allocation2 + $0x38] sm:$0xff]   ;;  %v376_v2 = vld [vmem:[#allocation2 + $0x30] sm:$0xff]  }
  0x1c   :  { %329 = vmatprep.subr.bf16.mxu0 %v440_v0  ;;  %345 = vmatprep.mubr.msk.bf16.mxu0 %vm441_vm0, %v440_v0  ;;  %v377_v3 = vld [vmem:[#allocation2 + $0x28] sm:$0xff]   ;;  %v384_v4 = vld [vmem:[#allocation4 + $0x38] sm:$0xff]   ;;  %v378_v5 = vld [vmem:[#allocation2 + $0x20] sm:$0xff]  }
  0x1d   :  { %349 = vmatprep.subr.bf16.mxu1 %v440_v0  ;;  %365 = vmatprep.mubr.msk.bf16.mxu1 %vm441_vm0, %v440_v0  ;;  %v385_v6 = vld [vmem:[#allocation4 + $0x30] sm:$0xff]   ;;  %v379_v7 = vld [vmem:[#allocation2 + $0x18] sm:$0xff]   ;;  %v386_v8 = vld [vmem:[#allocation4 + $0x28] sm:$0xff]  }
  0x1e   :  { %330 = vmatpush3.bf16.msra.mxu0 %v375_v1  ;;  %350 = vmatpush3.bf16.msra.mxu1 %v384_v4  ;;  %v380_v9 = vld [vmem:[#allocation2 + $0x10] sm:$0xff]   ;;  %v387_v10 = vld [vmem:[#allocation4 + $0x20] sm:$0xff]   ;;  %v381_v11 = vld [vmem:[#allocation2 + $0x8] sm:$0xff]  }
  0x1f   :  { %331 = vmatprep.subr.bf16.mxu0 %v440_v0  ;;  %351 = vmatprep.subr.bf16.mxu1 %v440_v0  ;;  %v388_v12 = vld [vmem:[#allocation4 + $0x18] sm:$0xff]   ;;  %v382_v13 = vld [vmem:[#allocation2] sm:$0xff]   ;;  %v389_v15 = vld [vmem:[#allocation4 + $0x10] sm:$0xff]  }
  0x20   :  { %v383_v14 = vld [vmem:[%s493_s0] sm:$0xff]   ;;  %v390_v16 = vld [vmem:[#allocation4 + $0x8] sm:$0xff]  }
  0x21   :  { %v391_v17 = vld [vmem:[#allocation4] sm:$0xff]  }
  0x22   :  { %332 = vmatpush3.bf16.msra.mxu0 %v376_v2  ;;  %352 = vmatpush3.bf16.msra.mxu1 %v385_v6  ;;  %v292_v18 = vld [vmem:[%s495_s2] ss:$0 sm:$0xff] }
  0x23   :  { %333 = vmatprep.subr.bf16.mxu0 %v440_v0  ;;  %353 = vmatprep.subr.bf16.mxu1 %v440_v0  ;;  %v302_v28 = vld [vmem:[%s497_s4] ss:$0 sm:$0xff] }
  0x26   :  { %334 = vmatpush3.bf16.msra.mxu0 %v377_v3  ;;  %354 = vmatpush3.bf16.msra.mxu1 %v386_v8 }
  0x27   :  { %335 = vmatprep.subr.bf16.mxu0 %v440_v0  ;;  %355 = vmatprep.subr.bf16.mxu1 %v440_v0 }
  0x2a   :  { %336 = vmatpush3.bf16.msra.mxu0 %v378_v5  ;;  %356 = vmatpush3.bf16.msra.mxu1 %v387_v10 }
  0x2b   :  { %337 = vmatprep.subr.bf16.mxu0 %v440_v0  ;;  %357 = vmatprep.subr.bf16.mxu1 %v440_v0 }
  0x2e   :  { %338 = vmatpush3.bf16.msra.mxu0 %v379_v7  ;;  %358 = vmatpush3.bf16.msra.mxu1 %v388_v12 }
  0x2f   :  { %339 = vmatprep.subr.bf16.mxu0 %v440_v0  ;;  %359 = vmatprep.subr.bf16.mxu1 %v440_v0 }
  0x32   :  { %340 = vmatpush3.bf16.msra.mxu0 %v380_v9  ;;  %360 = vmatpush3.bf16.msra.mxu1 %v389_v15 }
  0x33   :  { %341 = vmatprep.subr.bf16.mxu0 %v440_v0  ;;  %361 = vmatprep.subr.bf16.mxu1 %v440_v0 }
  0x36   :  { %342 = vmatpush3.bf16.msra.mxu0 %v381_v11  ;;  %362 = vmatpush3.bf16.msra.mxu1 %v390_v16 }
  0x37   :  { %343 = vmatprep.subr.bf16.mxu0 %v440_v0  ;;  %363 = vmatprep.subr.bf16.mxu1 %v440_v0 }
  0x3a   :  { %344 = vmatpush3.bf16.msra.mxu0 %v382_v13  ;;  %364 = vmatpush3.bf16.msra.mxu1 %v391_v17 }
  0x3d   :  { %346 = vmatmul.mubr.bf16.vlgmr.msra.gmra.mxu0 %v383_v14 }
  0xfd   :  { %v162_v19 = vpop.f32.mrf.mxu0 }
  0xfe   :  { %v163_v21 = vadd.f32 %v292_v18, %v162_v19 }
  0xff   :  { %v347_v20 = vpop.f32.mrf.mxu0 }
 0x100   :  { %v169_v25 = vmax.f32 %v163_v21, 0.0 }
 0x101   :  { %v165_v22 = vpop.f32.mrf.mxu0 }
 0x102   :  { %v166_v23 = vadd.f32 %v292_v18, %v165_v22 }
 0x103   :  { %v348_v24 = vpop.f32.mrf.mxu0 }
 0x104   :  { %v170_v26 = vmax.f32 %v166_v23, 0.0 }
 0x106   :  { %v171_v27 = vpack.c.bf16 %v170_v26, %v169_v25 }
 0x108   :  { %366 = vmatmul.mubr.bf16.vlgmr.msra.gmra.mxu1 %v171_v27 }
 0x1c8   :  { %v277_v29 = vpop.f32.mrf.mxu1 }
 0x1c9   :  { %v278_v30 = vadd.f32 %v302_v28, %v277_v29 }
 0x1ca   :  { %v367_v31 = vpop.f32.mrf.mxu1 }
 0x1cb   :  { %284 = vst [vmem:[%s498_s5] sm:$0xff] %v278_v30 }
 0x1cc   :  { %v280_v32 = vpop.f32.mrf.mxu1 }
 0x1cd   :  { %v281_v33 = vadd.f32 %v302_v28, %v280_v32 }
 0x1ce   :  { %v368_v34 = vpop.f32.mrf.mxu1 }
 0x1cf   :  { %285 = vst [vmem:[%s498_s5 + $0x8] sm:$0xff] %v281_v33 }
 0x1d0   :  { %290 = vsyncpa [#allocation3], 1 }
 0x1d1   :  { %291 = vsyncpa [#allocation5], 1 }

</bundles_post_ra>
